<compile_context>
chip_gen: v5e
topology: v5e:2x2
jax: 0.10.0
libtpu: 0.0.40
codegen_flags: <defaults>
</compile_context>

<pallas_src>
import functools

import jax
import jax.numpy as jnp
from jax.experimental import pallas as pl
from jax.experimental.pallas import tpu as pltpu


# ---------------------------------------------------------------------------
# small static helpers
# ---------------------------------------------------------------------------
def _round_up(a, b):
    return (a + b - 1) // b * b


def _fit_last(a, n):
    cur = a.shape[-1]
    if cur < n:
        return jnp.pad(a, ((0, 0), (0, 0), (0, n - cur)))
    return a[:, :, :n]


def _pick_group_block(G, c_in_pg_eff, c_out_pg, c_in_eff, c_out):
    """Smallest divisor of G giving sublane-aligned channel blocks."""
    for gb in range(1, G + 1):
        if G % gb:
            continue
        cin_blk = gb * c_in_pg_eff
        cout_blk = gb * c_out_pg
        ok_in = (cin_blk % 16 == 0) or (cin_blk == c_in_eff)   # bf16 sublane tile
        ok_out = (cout_blk % 8 == 0) or (cout_blk == c_out)    # f32 sublane tile
        if ok_in and ok_out:
            return gb
    return G


def _pick_l_tile(L_out, per_col_bytes, budget=8 << 20, max_tile=1024):
    """Largest 128*2^n length tile that stays inside a conservative VMEM budget."""
    top = min(max_tile, max(128, _round_up(L_out, 128)))
    t = 128
    while t * 2 <= top and (t * 2) * per_col_bytes <= budget:
        t *= 2
    return t


# ---------------------------------------------------------------------------
# Conv1d (+ optional LeakyReLU(0.2)) kernel.
#   x_ref: (GB*C_in_pg_eff, L_tile + K_eff - 1)   bf16 (phase-stacked, padded, halo)
#   w_ref: (GB*C_out_pg,    K_eff*C_in_pg_eff)    bf16 (tap-major im2col layout)
#   b_ref: (GB*C_out_pg, 1)                       f32
#   o_ref: (GB*C_out_pg, L_tile)                  f32
#   pat_refs: VMEM scratch (K_eff*C_in_pg_eff, L_tile) bf16  (im2col patch buffers)
# ---------------------------------------------------------------------------
def _conv1d_kernel(x_ref, w_ref, b_ref, o_ref, *pat_refs, k_eff, c_in_pg, c_out_pg,
                   groups_per_blk, l_tile, lrelu, use_im2col):
    for g in range(groups_per_blk):                 # small static loop (<= ~4 groups)
        w_g = w_ref[pl.ds(g * c_out_pg, c_out_pg), :]
        if use_im2col:
            # build the (K_eff*C_in_pg, L_tile) patch matrix, one MXU matmul per group
            p_ref = pat_refs[g % len(pat_refs)]
            for k in range(k_eff):
                p_ref[pl.ds(k * c_in_pg, c_in_pg), :] = (
                    x_ref[pl.ds(g * c_in_pg, c_in_pg), pl.ds(k, l_tile)])
            acc = jnp.dot(w_g, p_ref[...], preferred_element_type=jnp.float32)
        else:
            # channels already give a deep contraction; per-tap accumulation
            acc = jnp.zeros((c_out_pg, l_tile), jnp.float32)
            for k in range(k_eff):
                xk = x_ref[pl.ds(g * c_in_pg, c_in_pg), pl.ds(k, l_tile)]
                wk = w_ref[pl.ds(g * c_out_pg, c_out_pg), pl.ds(k * c_in_pg, c_in_pg)]
                acc = acc + jnp.dot(wk, xk, preferred_element_type=jnp.float32)
        y = acc + b_ref[pl.ds(g * c_out_pg, c_out_pg), :]       # bias in f32
        if lrelu:
            y = jnp.where(y > 0, y, 0.2 * y)                    # LeakyReLU(0.2) in f32
        o_ref[pl.ds(g * c_out_pg, c_out_pg), :] = y.astype(o_ref.dtype)


@functools.partial(jax.jit,
                   static_argnames=("stride", "padding", "groups", "reflect_pad", "lrelu"))
def conv1d_pallas(x, w, b, *, stride, padding, groups, reflect_pad, lrelu):
    """PyTorch-semantics Conv1d on NCL input (padding / phase-stacking in glue)."""
    B, C_in, L = x.shape
    C_out, C_in_pg, K = w.shape
    G = groups
    assert C_in == C_in_pg * G, "channel/group mismatch (would also fail in PyTorch)"
    C_out_pg = C_out // G
    S = stride
    L_out = (L + 2 * padding - K) // S + 1
    assert L_out > 0, "input too short for this conv"
    if reflect_pad and padding > 0:
        assert padding < L, "reflection pad requires L > padding"

    # stride-S conv  ->  stride-1 conv over S phases folded into channels
    K_eff = -(-K // S)                  # ceil(K / stride)
    C_in_pg_eff = C_in_pg * S
    C_in_eff = C_in * S
    CK = K_eff * C_in_pg_eff
    use_im2col = C_in_pg_eff < 128      # only pack taps when contraction would be shallow

    GB = _pick_group_block(G, C_in_pg_eff, C_out_pg, C_in_eff, C_out)
    cin_blk = GB * C_in_pg_eff
    cout_blk = GB * C_out_pg
    n_cblk = G // GB
    n_slots = 2 if (use_im2col and GB > 1) else 1

    per_col = 4 * cin_blk + 8 * cout_blk + 4 * C_out_pg
    if use_im2col:
        per_col += 2 * n_slots * CK
    L_tile = _pick_l_tile(L_out, per_col)
    L_out_pad = _round_up(L_out, L_tile)
    n_l = L_out_pad // L_tile
    halo = K_eff - 1
    tile_cols = L_tile + halo

    # --- pad (reflect/zero) + right-pad for tiling, phase-stack, cast to bf16 ---
    L_tot = _round_up(max((L_out_pad + K_eff - 1) * S, L + 2 * padding), S)
    L_phase = L_tot // S
    if reflect_pad and padding > 0:
        xp = jnp.pad(x, ((0, 0), (0, 0), (padding, padding)), mode="reflect")
        xp = jnp.pad(xp, ((0, 0), (0, 0), (0, L_tot - (L + 2 * padding))))
    else:
        xp = jnp.pad(x, ((0, 0), (0, 0), (padding, L_tot - L - padding)))
    if S > 1:
        xp = xp.reshape(B, C_in, L_phase, S).transpose(0, 1, 3, 2)
        xp = xp.reshape(B, C_in_eff, L_phase)
    x_ph = xp.astype(jnp.bfloat16)

    # overlapping length tiles with a (K_eff-1)-column halo, materialized in glue
    if n_l == 1:
        x_t = x_ph[:, None, :, :tile_cols]
    else:
        x_t = jnp.stack(
            [x_ph[:, :, i * L_tile: i * L_tile + tile_cols] for i in range(n_l)], axis=1)

    # weights -> (C_out, K_eff*C_in_pg_eff): tap-major, (channel,phase)-minor, bf16
    w_p = jnp.pad(w, ((0, 0), (0, 0), (0, K_eff * S - K)))
    w_e = w_p.reshape(C_out, C_in_pg, K_eff, S).transpose(0, 1, 3, 2)
    w_e = w_e.reshape(C_out, C_in_pg_eff, K_eff).transpose(0, 2, 1)
    w_k = w_e.reshape(C_out, CK).astype(jnp.bfloat16)
    b2 = b.reshape(C_out, 1).astype(jnp.float32)

    kernel = functools.partial(
        _conv1d_kernel, k_eff=K_eff, c_in_pg=C_in_pg_eff, c_out_pg=C_out_pg,
        groups_per_blk=GB, l_tile=L_tile, lrelu=lrelu, use_im2col=use_im2col)
    scratch = ([pltpu.VMEM((CK, L_tile), jnp.bfloat16) for _ in range(n_slots)]
               if use_im2col else [])

    out = pl.pallas_call(
        kernel,
        out_shape=jax.ShapeDtypeStruct((B, C_out, L_out_pad), x.dtype),
        grid=(B, n_cblk, n_l),
        in_specs=[
            pl.BlockSpec((pl.Squeezed(), pl.Squeezed(), cin_blk, tile_cols),
                         lambda bb, cc, ll: (bb, ll, cc, 0)),
            pl.BlockSpec((cout_blk, CK), lambda bb, cc, ll: (cc, 0)),
            pl.BlockSpec((cout_blk, 1), lambda bb, cc, ll: (cc, 0)),
        ],
        out_specs=pl.BlockSpec((pl.Squeezed(), cout_blk, L_tile),
                               lambda bb, cc, ll: (bb, cc, ll)),
        scratch_shapes=scratch,
        compiler_params=pltpu.CompilerParams(
            dimension_semantics=("parallel", "parallel", "parallel"),
            vmem_limit_bytes=48 * 1024 * 1024),
    )(x_t, w_k, b2)

    if L_out_pad != L_out:
        out = out[:, :, :L_out]
    return out


# ---------------------------------------------------------------------------
# AvgPool1d(kernel=4, stride=2, padding=1, count_include_pad=False)
#   xe_ref/xo_ref: (C, L_tile + 1)  even/odd phases of the zero-padded signal
#   inv_ref:       (1, L_tile)      per-position 1/count (0 in padded tail)
#   o_ref:         (C, L_tile)
# ---------------------------------------------------------------------------
def _avgpool_kernel(xe_ref, xo_ref, inv_ref, o_ref, *, l_tile):
    s = (xe_ref[:, pl.ds(0, l_tile)] + xo_ref[:, pl.ds(0, l_tile)]
         + xe_ref[:, pl.ds(1, l_tile)] + xo_ref[:, pl.ds(1, l_tile)])
    o_ref[...] = (s * inv_ref[...]).astype(o_ref.dtype)


@jax.jit
def avgpool1d_pallas(x):
    B, C, L = x.shape
    L_out = (L + 2 * 1 - 4) // 2 + 1
    if L_out >= 128:
        L_tile = 128
        top = _round_up(L_out, 128)
        while L_tile * 2 <= min(1024, top):
            L_tile *= 2
        L_out_pad = _round_up(L_out, L_tile)
    else:
        L_tile, L_out_pad = L_out, L_out
    n_l = L_out_pad // L_tile

    xp = jnp.pad(x, ((0, 0), (0, 0), (1, 1)))              # zero pad = 1
    xe = _fit_last(xp[:, :, 0::2], L_out_pad + 1)           # even phase
    xo = _fit_last(xp[:, :, 1::2], L_out_pad + 1)           # odd phase
    if n_l == 1:
        xe_t, xo_t = xe[:, None], xo[:, None]
    else:
        xe_t = jnp.stack(
            [xe[:, :, i * L_tile: i * L_tile + L_tile + 1] for i in range(n_l)], axis=1)
        xo_t = jnp.stack(
            [xo[:, :, i * L_tile: i * L_tile + L_tile + 1] for i in range(n_l)], axis=1)

    j = jnp.arange(L_out_pad)
    counts = jnp.maximum(
        jnp.minimum(2 * j + 2, L - 1) - jnp.maximum(2 * j - 1, 0) + 1, 1)
    inv = jnp.where(j < L_out, 1.0 / counts, 0.0).astype(x.dtype).reshape(1, L_out_pad)

    out = pl.pallas_call(
        functools.partial(_avgpool_kernel, l_tile=L_tile),
        out_shape=jax.ShapeDtypeStruct((B, C, L_out_pad), x.dtype),
        grid=(B, n_l),
        in_specs=[
            pl.BlockSpec((pl.Squeezed(), pl.Squeezed(), C, L_tile + 1),
                         lambda bb, ll: (bb, ll, 0, 0)),
            pl.BlockSpec((pl.Squeezed(), pl.Squeezed(), C, L_tile + 1),
                         lambda bb, ll: (bb, ll, 0, 0)),
            pl.BlockSpec((1, L_tile), lambda bb, ll: (0, ll)),
        ],
        out_specs=pl.BlockSpec((pl.Squeezed(), C, L_tile), lambda bb, ll: (bb, 0, ll)),
        compiler_params=pltpu.CompilerParams(
            dimension_semantics=("parallel", "parallel"),
            vmem_limit_bytes=48 * 1024 * 1024),
    )(xe_t, xo_t, inv)

    if L_out_pad != L_out:
        out = out[:, :, :L_out]
    return out


# ---------------------------------------------------------------------------
# Parameter construction mirroring NLayerDiscriminator.__init__ exactly
# (including the post-loop conv taking `nf_prev` as in_channels).
# ---------------------------------------------------------------------------
def make_disc_params(key, nsources, ndf, n_layers, downsampling_factor):
    specs = [dict(cin=nsources, cout=ndf, k=15, stride=1, groups=1,
                  pad=7, reflect=True, lrelu=True)]
    nf = ndf
    nf_prev = ndf
    stride = downsampling_factor
    for _ in range(1, n_layers + 1):
        nf_prev = nf
        nf = min(nf * stride, 1024)
        specs.append(dict(cin=nf_prev, cout=nf, k=stride * 10 + 1, stride=stride,
                          groups=nf_prev // 4, pad=stride * 5, reflect=False, lrelu=True))
    nf = min(nf * 2, 1024)
    specs.append(dict(cin=nf_prev, cout=nf, k=5, stride=1, groups=1,
                      pad=2, reflect=False, lrelu=True))
    specs.append(dict(cin=nf, cout=1, k=3, stride=1, groups=1,
                      pad=1, reflect=False, lrelu=False))

    params = []
    for spec in specs:
        key, kw, kb = jax.random.split(key, 3)
        w = 0.02 * jax.random.normal(
            kw, (spec["cout"], spec["cin"] // spec["groups"], spec["k"]), jnp.float32)
        b = 0.02 * jax.random.normal(kb, (spec["cout"],), jnp.float32)
        params.append((spec, w, b))
    return params


def nlayer_disc_forward(x, disc_params):
    for spec, w, b in disc_params:
        x = conv1d_pallas(x, w, b, stride=spec["stride"], padding=spec["pad"],
                          groups=spec["groups"], reflect_pad=spec["reflect"],
                          lrelu=spec["lrelu"])
    return x[:, 0, :]                                # .squeeze(1) -> (B, L_out)


def audio_discriminator_forward(audio, all_params):
    results = []
    x = audio
    for disc_params in all_params:
        results.append(nlayer_disc_forward(x, disc_params))
        x = avgpool1d_pallas(x)
    return results


if __name__ == "__main__":
    # Small, channel-consistent config (downsampling_factor=1 keeps the
    # grouped-conv / post-loop channel counts valid, matching PyTorch's constraint).
    B, naudios, L = 2, 2, 64
    ndiscriminators, nfilters, n_layers, downsampling_factor = 2, 8, 2, 1

    key = jax.random.PRNGKey(0)
    key, kx = jax.random.split(key)
    audio = jax.random.normal(kx, (B, naudios, L), jnp.float32)

    all_params = []
    for _ in range(ndiscriminators):
        key, ksub = jax.random.split(key)
        all_params.append(
            make_disc_params(ksub, naudios, nfilters, n_layers, downsampling_factor))

    results = audio_discriminator_forward(audio, all_params)
    for r in results:
        jax.block_until_ready(r)

    assert results[0].shape == (B, L)
    assert results[1].shape == (B, L // 2)
    for r in results:
        assert bool(jnp.all(jnp.isfinite(r)))
    print("KERNEL_OK")
</pallas_src>

<mosaic_0001>
module attributes {stable_mosaic.version = 11 : i64} {
  func.func @_conv1d_kernel(%arg0: i32, %arg1: i32, %arg2: i32, %arg3: memref<1x1x2x142xbf16, #tpu.memory_space<vmem>>, %arg4: memref<8x30xbf16, #tpu.memory_space<vmem>>, %arg5: memref<8x1xf32, #tpu.memory_space<vmem>>, %arg6: memref<1x8x128xf32, #tpu.memory_space<vmem>>, %arg7: memref<30x128xbf16, #tpu.memory_space<vmem>>) attributes {dimension_semantics = [#tpu.dimension_semantics<parallel>, #tpu.dimension_semantics<parallel>, #tpu.dimension_semantics<parallel>], iteration_bounds = array<i64: 2, 1, 1>, scalar_prefetch = 0 : i64, scratch_operands = 1 : i64, tpu.core_type = #tpu.core_type<tc>, window_params = [{transform_indices = @transform_0, window_bounds = array<i64: 1, 1, 2, 142>}, {transform_indices = @transform_1, window_bounds = array<i64: 8, 30>}, {transform_indices = @transform_2, window_bounds = array<i64: 8, 1>}, {transform_indices = @transform_3, window_bounds = array<i64: 1, 8, 128>}]} {
    %c0 = arith.constant 0 : index
    %c0_0 = arith.constant 0 : index
    %0 = vector.load %arg4[%c0, %c0_0] : memref<8x30xbf16, #tpu.memory_space<vmem>>, vector<8x30xbf16>
    %c0_1 = arith.constant 0 : index
    %c0_2 = arith.constant 0 : index
    %c0_3 = arith.constant 0 : index
    %c0_4 = arith.constant 0 : index
    %1 = vector.load %arg3[%c0_1, %c0_2, %c0_3, %c0_4] : memref<1x1x2x142xbf16, #tpu.memory_space<vmem>>, vector<1x1x2x128xbf16>
    %2 = vector.shape_cast %1 : vector<1x1x2x128xbf16> to vector<2x128xbf16>
    %c0_5 = arith.constant 0 : index
    %c0_6 = arith.constant 0 : index
    %3 = vector.load %arg7[%c0_5, %c0_6] : memref<30x128xbf16, #tpu.memory_space<vmem>>, vector<2x128xbf16>
    tpu.vector_store %arg7[%c0_5, %c0_6], %2 {strides = array<i32>} : memref<30x128xbf16, #tpu.memory_space<vmem>>, vector<2x128xbf16>,
    %c0_7 = arith.constant 0 : index
    %c0_8 = arith.constant 0 : index
    %c0_9 = arith.constant 0 : index
    %c1 = arith.constant 1 : index
    %4 = vector.load %arg3[%c0_7, %c0_8, %c0_9, %c1] : memref<1x1x2x142xbf16, #tpu.memory_space<vmem>>, vector<1x1x2x128xbf16>
    %5 = vector.shape_cast %4 : vector<1x1x2x128xbf16> to vector<2x128xbf16>
    %c2 = arith.constant 2 : index
    %c0_10 = arith.constant 0 : index
    %6 = vector.load %arg7[%c2, %c0_10] : memref<30x128xbf16, #tpu.memory_space<vmem>>, vector<2x128xbf16>
    tpu.vector_store %arg7[%c2, %c0_10], %5 {strides = array<i32>} : memref<30x128xbf16, #tpu.memory_space<vmem>>, vector<2x128xbf16>,
    %c0_11 = arith.constant 0 : index
    %c0_12 = arith.constant 0 : index
    %c0_13 = arith.constant 0 : index
    %c2_14 = arith.constant 2 : index
    %7 = vector.load %arg3[%c0_11, %c0_12, %c0_13, %c2_14] : memref<1x1x2x142xbf16, #tpu.memory_space<vmem>>, vector<1x1x2x128xbf16>
    %8 = vector.shape_cast %7 : vector<1x1x2x128xbf16> to vector<2x128xbf16>
    %c4 = arith.constant 4 : index
    %c0_15 = arith.constant 0 : index
    %9 = vector.load %arg7[%c4, %c0_15] : memref<30x128xbf16, #tpu.memory_space<vmem>>, vector<2x128xbf16>
    tpu.vector_store %arg7[%c4, %c0_15], %8 {strides = array<i32>} : memref<30x128xbf16, #tpu.memory_space<vmem>>, vector<2x128xbf16>,
    %c0_16 = arith.constant 0 : index
    %c0_17 = arith.constant 0 : index
    %c0_18 = arith.constant 0 : index
    %c3 = arith.constant 3 : index
    %10 = vector.load %arg3[%c0_16, %c0_17, %c0_18, %c3] : memref<1x1x2x142xbf16, #tpu.memory_space<vmem>>, vector<1x1x2x128xbf16>
    %11 = vector.shape_cast %10 : vector<1x1x2x128xbf16> to vector<2x128xbf16>
    %c6 = arith.constant 6 : index
    %c0_19 = arith.constant 0 : index
    %12 = vector.load %arg7[%c6, %c0_19] : memref<30x128xbf16, #tpu.memory_space<vmem>>, vector<2x128xbf16>
    tpu.vector_store %arg7[%c6, %c0_19], %11 {strides = array<i32>} : memref<30x128xbf16, #tpu.memory_space<vmem>>, vector<2x128xbf16>,
    %c0_20 = arith.constant 0 : index
    %c0_21 = arith.constant 0 : index
    %c0_22 = arith.constant 0 : index
    %c4_23 = arith.constant 4 : index
    %13 = vector.load %arg3[%c0_20, %c0_21, %c0_22, %c4_23] : memref<1x1x2x142xbf16, #tpu.memory_space<vmem>>, vector<1x1x2x128xbf16>
    %14 = vector.shape_cast %13 : vector<1x1x2x128xbf16> to vector<2x128xbf16>
    %c8 = arith.constant 8 : index
    %c0_24 = arith.constant 0 : index
    %15 = vector.load %arg7[%c8, %c0_24] : memref<30x128xbf16, #tpu.memory_space<vmem>>, vector<2x128xbf16>
    tpu.vector_store %arg7[%c8, %c0_24], %14 {strides = array<i32>} : memref<30x128xbf16, #tpu.memory_space<vmem>>, vector<2x128xbf16>,
    %c0_25 = arith.constant 0 : index
    %c0_26 = arith.constant 0 : index
    %c0_27 = arith.constant 0 : index
    %c5 = arith.constant 5 : index
    %16 = vector.load %arg3[%c0_25, %c0_26, %c0_27, %c5] : memref<1x1x2x142xbf16, #tpu.memory_space<vmem>>, vector<1x1x2x128xbf16>
    %17 = vector.shape_cast %16 : vector<1x1x2x128xbf16> to vector<2x128xbf16>
    %c10 = arith.constant 10 : index
    %c0_28 = arith.constant 0 : index
    %18 = vector.load %arg7[%c10, %c0_28] : memref<30x128xbf16, #tpu.memory_space<vmem>>, vector<2x128xbf16>
    tpu.vector_store %arg7[%c10, %c0_28], %17 {strides = array<i32>} : memref<30x128xbf16, #tpu.memory_space<vmem>>, vector<2x128xbf16>,
    %c0_29 = arith.constant 0 : index
    %c0_30 = arith.constant 0 : index
    %c0_31 = arith.constant 0 : index
    %c6_32 = arith.constant 6 : index
    %19 = vector.load %arg3[%c0_29, %c0_30, %c0_31, %c6_32] : memref<1x1x2x142xbf16, #tpu.memory_space<vmem>>, vector<1x1x2x128xbf16>
    %20 = vector.shape_cast %19 : vector<1x1x2x128xbf16> to vector<2x128xbf16>
    %c12 = arith.constant 12 : index
    %c0_33 = arith.constant 0 : index
    %21 = vector.load %arg7[%c12, %c0_33] : memref<30x128xbf16, #tpu.memory_space<vmem>>, vector<2x128xbf16>
    tpu.vector_store %arg7[%c12, %c0_33], %20 {strides = array<i32>} : memref<30x128xbf16, #tpu.memory_space<vmem>>, vector<2x128xbf16>,
    %c0_34 = arith.constant 0 : index
    %c0_35 = arith.constant 0 : index
    %c0_36 = arith.constant 0 : index
    %c7 = arith.constant 7 : index
    %22 = vector.load %arg3[%c0_34, %c0_35, %c0_36, %c7] : memref<1x1x2x142xbf16, #tpu.memory_space<vmem>>, vector<1x1x2x128xbf16>
    %23 = vector.shape_cast %22 : vector<1x1x2x128xbf16> to vector<2x128xbf16>
    %c14 = arith.constant 14 : index
    %c0_37 = arith.constant 0 : index
    %24 = vector.load %arg7[%c14, %c0_37] : memref<30x128xbf16, #tpu.memory_space<vmem>>, vector<2x128xbf16>
    tpu.vector_store %arg7[%c14, %c0_37], %23 {strides = array<i32>} : memref<30x128xbf16, #tpu.memory_space<vmem>>, vector<2x128xbf16>,
    %c0_38 = arith.constant 0 : index
    %c0_39 = arith.constant 0 : index
    %c0_40 = arith.constant 0 : index
    %c8_41 = arith.constant 8 : index
    %25 = vector.load %arg3[%c0_38, %c0_39, %c0_40, %c8_41] : memref<1x1x2x142xbf16, #tpu.memory_space<vmem>>, vector<1x1x2x128xbf16>
    %26 = vector.shape_cast %25 : vector<1x1x2x128xbf16> to vector<2x128xbf16>
    %c16 = arith.constant 16 : index
    %c0_42 = arith.constant 0 : index
    %27 = vector.load %arg7[%c16, %c0_42] : memref<30x128xbf16, #tpu.memory_space<vmem>>, vector<2x128xbf16>
    tpu.vector_store %arg7[%c16, %c0_42], %26 {strides = array<i32>} : memref<30x128xbf16, #tpu.memory_space<vmem>>, vector<2x128xbf16>,
    %c0_43 = arith.constant 0 : index
    %c0_44 = arith.constant 0 : index
    %c0_45 = arith.constant 0 : index
    %c9 = arith.constant 9 : index
    %28 = vector.load %arg3[%c0_43, %c0_44, %c0_45, %c9] : memref<1x1x2x142xbf16, #tpu.memory_space<vmem>>, vector<1x1x2x128xbf16>
    %29 = vector.shape_cast %28 : vector<1x1x2x128xbf16> to vector<2x128xbf16>
    %c18 = arith.constant 18 : index
    %c0_46 = arith.constant 0 : index
    %30 = vector.load %arg7[%c18, %c0_46] : memref<30x128xbf16, #tpu.memory_space<vmem>>, vector<2x128xbf16>
    tpu.vector_store %arg7[%c18, %c0_46], %29 {strides = array<i32>} : memref<30x128xbf16, #tpu.memory_space<vmem>>, vector<2x128xbf16>,
    %c0_47 = arith.constant 0 : index
    %c0_48 = arith.constant 0 : index
    %c0_49 = arith.constant 0 : index
    %c10_50 = arith.constant 10 : index
    %31 = vector.load %arg3[%c0_47, %c0_48, %c0_49, %c10_50] : memref<1x1x2x142xbf16, #tpu.memory_space<vmem>>, vector<1x1x2x128xbf16>
    %32 = vector.shape_cast %31 : vector<1x1x2x128xbf16> to vector<2x128xbf16>
    %c20 = arith.constant 20 : index
    %c0_51 = arith.constant 0 : index
    %33 = vector.load %arg7[%c20, %c0_51] : memref<30x128xbf16, #tpu.memory_space<vmem>>, vector<2x128xbf16>
    tpu.vector_store %arg7[%c20, %c0_51], %32 {strides = array<i32>} : memref<30x128xbf16, #tpu.memory_space<vmem>>, vector<2x128xbf16>,
    %c0_52 = arith.constant 0 : index
    %c0_53 = arith.constant 0 : index
    %c0_54 = arith.constant 0 : index
    %c11 = arith.constant 11 : index
    %34 = vector.load %arg3[%c0_52, %c0_53, %c0_54, %c11] : memref<1x1x2x142xbf16, #tpu.memory_space<vmem>>, vector<1x1x2x128xbf16>
    %35 = vector.shape_cast %34 : vector<1x1x2x128xbf16> to vector<2x128xbf16>
    %c22 = arith.constant 22 : index
    %c0_55 = arith.constant 0 : index
    %36 = vector.load %arg7[%c22, %c0_55] : memref<30x128xbf16, #tpu.memory_space<vmem>>, vector<2x128xbf16>
    tpu.vector_store %arg7[%c22, %c0_55], %35 {strides = array<i32>} : memref<30x128xbf16, #tpu.memory_space<vmem>>, vector<2x128xbf16>,
    %c0_56 = arith.constant 0 : index
    %c0_57 = arith.constant 0 : index
    %c0_58 = arith.constant 0 : index
    %c12_59 = arith.constant 12 : index
    %37 = vector.load %arg3[%c0_56, %c0_57, %c0_58, %c12_59] : memref<1x1x2x142xbf16, #tpu.memory_space<vmem>>, vector<1x1x2x128xbf16>
    %38 = vector.shape_cast %37 : vector<1x1x2x128xbf16> to vector<2x128xbf16>
    %c24 = arith.constant 24 : index
    %c0_60 = arith.constant 0 : index
    %39 = vector.load %arg7[%c24, %c0_60] : memref<30x128xbf16, #tpu.memory_space<vmem>>, vector<2x128xbf16>
    tpu.vector_store %arg7[%c24, %c0_60], %38 {strides = array<i32>} : memref<30x128xbf16, #tpu.memory_space<vmem>>, vector<2x128xbf16>,
    %c0_61 = arith.constant 0 : index
    %c0_62 = arith.constant 0 : index
    %c0_63 = arith.constant 0 : index
    %c13 = arith.constant 13 : index
    %40 = vector.load %arg3[%c0_61, %c0_62, %c0_63, %c13] : memref<1x1x2x142xbf16, #tpu.memory_space<vmem>>, vector<1x1x2x128xbf16>
    %41 = vector.shape_cast %40 : vector<1x1x2x128xbf16> to vector<2x128xbf16>
    %c26 = arith.constant 26 : index
    %c0_64 = arith.constant 0 : index
    %42 = vector.load %arg7[%c26, %c0_64] : memref<30x128xbf16, #tpu.memory_space<vmem>>, vector<2x128xbf16>
    tpu.vector_store %arg7[%c26, %c0_64], %41 {strides = array<i32>} : memref<30x128xbf16, #tpu.memory_space<vmem>>, vector<2x128xbf16>,
    %c0_65 = arith.constant 0 : index
    %c0_66 = arith.constant 0 : index
    %c0_67 = arith.constant 0 : index
    %c14_68 = arith.constant 14 : index
    %43 = vector.load %arg3[%c0_65, %c0_66, %c0_67, %c14_68] : memref<1x1x2x142xbf16, #tpu.memory_space<vmem>>, vector<1x1x2x128xbf16>
    %44 = vector.shape_cast %43 : vector<1x1x2x128xbf16> to vector<2x128xbf16>
    %c28 = arith.constant 28 : index
    %c0_69 = arith.constant 0 : index
    %45 = vector.load %arg7[%c28, %c0_69] : memref<30x128xbf16, #tpu.memory_space<vmem>>, vector<2x128xbf16>
    tpu.vector_store %arg7[%c28, %c0_69], %44 {strides = array<i32>} : memref<30x128xbf16, #tpu.memory_space<vmem>>, vector<2x128xbf16>,
    %c0_70 = arith.constant 0 : index
    %c0_71 = arith.constant 0 : index
    %46 = vector.load %arg7[%c0_70, %c0_71] : memref<30x128xbf16, #tpu.memory_space<vmem>>, vector<30x128xbf16>
    %cst = arith.constant dense<0.000000e+00> : vector<8x128xf32>
    %47 = tpu.matmul %0, %46, %cst {dimension_numbers = #tpu.dot_dimension_numbers<[1], [0], [0], [1], [0, 0, 1, 1], [], []>} : vector<8x30xbf16>, vector<30x128xbf16>, vector<8x128xf32> -> vector<8x128xf32>
    %c0_72 = arith.constant 0 : index
    %c0_73 = arith.constant 0 : index
    %48 = vector.load %arg5[%c0_72, %c0_73] : memref<8x1xf32, #tpu.memory_space<vmem>>, vector<8x1xf32>
    %49 = vector.broadcast %48 : vector<8x1xf32> to vector<8x128xf32>
    %50 = arith.addf %47, %49 : vector<8x128xf32>
    %cst_74 = arith.constant 0.000000e+00 : f32
    %51 = vector.broadcast %cst_74 : f32 to vector<8x128xf32>
    %52 = arith.cmpf ogt, %50, %51 : vector<8x128xf32>
    %cst_75 = arith.constant 2.000000e-01 : f32
    %53 = vector.broadcast %cst_75 : f32 to vector<8x128xf32>
    %54 = arith.mulf %53, %50 : vector<8x128xf32>
    %55 = arith.select %52, %50, %54 : vector<8x128xi1>, vector<8x128xf32>
    %c0_76 = arith.constant 0 : index
    %c0_77 = arith.constant 0 : index
    %c0_78 = arith.constant 0 : index
    %56 = vector.load %arg6[%c0_76, %c0_77, %c0_78] : memref<1x8x128xf32, #tpu.memory_space<vmem>>, vector<1x8x128xf32>
    %57 = vector.shape_cast %56 : vector<1x8x128xf32> to vector<8x128xf32>
    %58 = vector.shape_cast %55 : vector<8x128xf32> to vector<1x8x128xf32>
    tpu.vector_store %arg6[%c0_76, %c0_77, %c0_78], %58 {strides = array<i32>} : memref<1x8x128xf32, #tpu.memory_space<vmem>>, vector<1x8x128xf32>,
    return
  }
  func.func @transform_0(%arg0: i32, %arg1: i32, %arg2: i32) -> (i32, i32, i32, i32) {
    %c0_i32 = arith.constant 0 : i32
    %c0_i32_0 = arith.constant 0 : i32
    return %arg0, %arg2, %arg1, %c0_i32 : i32, i32, i32, i32
  }
  func.func @transform_1(%arg0: i32, %arg1: i32, %arg2: i32) -> (i32, i32) {
    %c0_i32 = arith.constant 0 : i32
    %c0_i32_0 = arith.constant 0 : i32
    return %arg1, %c0_i32 : i32, i32
  }
  func.func @transform_2(%arg0: i32, %arg1: i32, %arg2: i32) -> (i32, i32) {
    %c0_i32 = arith.constant 0 : i32
    %c0_i32_0 = arith.constant 0 : i32
    return %arg1, %c0_i32 : i32, i32
  }
  func.func @transform_3(%arg0: i32, %arg1: i32, %arg2: i32) -> (i32, i32, i32) {
    %c0_i32 = arith.constant 0 : i32
    return %arg0, %arg1, %arg2 : i32, i32, i32
  }
}

</mosaic_0001>

<bundles_post_ra>
// kernel: conv1d_pallas.1
= control target key start
LH: loop header
LB: loop body
LE: loop exit
PB: predicated region body
PF: predicated region fallthrough
CT: control target
= control target key end

     0   :  { %8 = vsyncpa [#allocation4], 0  ;;  %s943_s0 = inlined_call_operand.vmem [shape: bf16[2,1,2,142], index: 0, kind: input, shape index: {}]   ;;  %s944_s1 = inlined_call_operand.vmem [shape: bf16[8,30], index: 1, kind: input, shape index: {}]   ;;  %s945_s2 = inlined_call_operand.vmem [shape: f32[8,1], index: 2, kind: input, shape index: {}]   ;;  %s946_s3 = inlined_call_operand.hbm [shape: f32[2,8,128], index: 3, kind: output, shape index: {}]  }
   0x1   :  { %10 = vsyncpa [#allocation4 + $0x1], 0  ;;  %s823_s12 = smov 0   ;;  %s825_s13 = smov 0  }
   0x2   :  { %s827_s14 = smov 0   ;;  %s829_s15 = smov 0  }
   0x3   :  { %s831_s16 = smov 0   ;;  %s833_s17 = smov 0  }
   0x4 LB: > { %s612_s18 = sadd.s32 4294967295, %s786_s17   ;;  %s613_s19 = sadd.s32 4294967294, %s786_s17   ;;  %s786_s17 = sphi %s833_s17, %s16_s17   ;;  %s782_s16 = sphi %s831_s16, %s953_s16   ;;  %s778_s15 = sphi %s829_s15, %s952_s15   ;;  %s774_s14 = sphi %s827_s14, %s951_s14   ;;  %s770_s13 = sphi %s825_s13, %s950_s13   ;;  %s766_s12 = sphi %s823_s12, %s949_s12  }
   0x5   : > { %s35_s20 = sadd.s32 1, %s782_s16  ;;  %s128_s21 = sadd.s32 1, %s774_s14 }
   0x6   : > { %p37_p0 = scmp.ge.s32.totalorder %s35_s20, 2  ;;  %p138_p1 = scmp.ne.s32.totalorder %s774_s14, %s770_s13 }
   0x7   : > { %p139_p2 = scmp.eq.s32.totalorder %s612_s18, 1  ;;  %p144_p3 = scmp.ne.s32.totalorder %s770_s13, %s766_s12 }
   0x8   : > { %s955_s20 = smov (%p37_p0, %s35_s20), 0  ;;  %p145_p5 = scmp.eq.s32.totalorder %s613_s19, 1 }
   0x9   : > { %p863_p4 = por %p139_p2, %p138_p1  ;;  %s121_s23 = ssub.s32 %s782_s16, %s955_s20 }
   0xa   : > { %p618_p6 = scmp.ge.s32.totalorder %s786_s17, 1  ;;  %p126_p7 = scmp.eq.s32.totalorder %s121_s23, 0 }
   0xb   : > { %p870_p8 = por %p145_p5, %p144_p3  ;;  %p192_p9 = scmp.lt.s32.totalorder %s786_s17, 3 }
   0xc   : > { %s876_s25 = scalar_select %p126_p7, %s774_s14, %s128_s21  }
   0xd   : > { %p193_p10 = pnand %p618_p6, %p192_p9 }
   0xe   : > { %p231_p11 = scmp.lt.s32.totalorder (!%p193_p10), %s778_s15, 1  ;;  %s788_s4 = smov (!%p193_p10), 127  }
   0xf   : > { %196 = sbr.rel (%p193_p10) target bundleno = 408 (0x198), region = 32  ;;  %s789_s5 = smov (!%p193_p10), 126  }
  0x10   : > { %s790_s6 = smov (!%p193_p10), 125   ;;  %s791_s7 = smov (!%p193_p10), 124  }
  0x11   : > { %s792_s8 = smov (!%p193_p10), 120   ;;  %s793_s9 = smov (!%p193_p10), 119  }
  0x12   : > { %s794_s10 = smov (!%p193_p10), 118   ;;  %s795_s11 = smov (!%p193_p10), 117  }
  0x13   : > { %s796_s18 = smov (!%p193_p10), 121   ;;  %s797_s19 = smov (!%p193_p10), 116  }
  0x14   : > { %s232_s26 = scalar_select %p231_p11, %s778_s15, 1  ;;  %vm277_vm0 = vcmask 1031168   ;;  %vm264_vm1 = vcmask 1039360   ;;  %vm290_vm2 = vcmask 1022976   ;;  %vm302_vm3 = vcmask 1014784  }
  0x15   : > { %s798_s21 = smov 115   ;;  %s799_s23 = smov 114   ;;  %vm353_vm4 = vcmask 982016   ;;  %vm366_vm5 = vcmask 973824   ;;  %vm404_vm6 = vcmask 949248   ;;  %vm379_vm7 = vcmask 965632  }
  0x16   : > { %s620_s27 = sshll.u32 %s232_s26, 1  ;;  %s800_s26 = smov 123   ;;  %vm417_vm8 = vcmask 941056   ;;  %vm392_vm9 = vcmask 957440   ;;  %vm315_vm10 = vcmask 1006592   ;;  %vm341_vm11 = vcmask 990208  }
  0x17   : > { %s883_s30 = scalar_lea.vmem %s943_s0, %s620_s27  ;;  %s801_s27 = smov 122   ;;  %vm430_vm12 = vcmask 932864   ;;  %vm328_vm13 = vcmask 998400   ;;  %vm459_vm14 = vcmask 1046528   ;;  %vm455_vm15 = vcmask 244736  }
  0x18   : > { %v255_v0 = vld [vmem:[%s883_s30] sm:$0x3]  ;;  %s728_s28 = scalar_lea.hbm %s946_s3, 16 }
  0x19   : > { %258 = vst [vmem:[#allocation1 + $0x1] ss:$4 sm:$0xff] %v255_v0  ;;  %v268_v1 = vld [vmem:[%s883_s30] sm:$0x3] }
  0x1a   : > { %v281_v3 = vld [vmem:[%s883_s30] sm:$0x3] }
  0x1b   : > { %v294_v5 = vld [vmem:[%s883_s30] sm:$0x3] }
  0x1c   : > { %v306_v7 = vld [vmem:[%s883_s30] sm:$0x3] }
  0x1d   : > { %v319_v9 = vld [vmem:[%s883_s30] sm:$0x3] }
  0x1e   : > { %v332_v11 = vld [vmem:[%s883_s30] sm:$0x3] }
  0x1f   : > { %v345_v13 = vld [vmem:[%s883_s30] sm:$0x3] }
  0x20   : > { %v259_v2 = vld [vmem:[#allocation1] sm:$0xff] }
  0x21   : > { %261 = vrot.lane.b32.xlu1 %v259_v2, %s788_s4  ;;  %271 = vst [vmem:[#allocation1 + $0x2] ss:$4 sm:$0xff] %v268_v1  ;;  %v357_v15 = vld [vmem:[%s883_s30] sm:$0x3]  ;;  %v802_v2 = vmov 0  }
  0x22   : > { %v370_v17 = vld [vmem:[%s883_s30] sm:$0x3]  ;;  %706 = vset.pattern.permute.xlu2 %v802_v2  ;;  %707 = vset.pattern.permute.xlu0 %v802_v2 }
  0x23   : > { %v383_v19 = vld [vmem:[%s883_s30] sm:$0x3] }
  0x24   : > { %v396_v21 = vld [vmem:[%s883_s30] sm:$0x3] }
  0x25   : > { %v408_v23 = vld [vmem:[%s883_s30] sm:$0x3] }
  0x26   : > { %v421_v25 = vld [vmem:[%s883_s30] sm:$0x3] }
  0x27   : > { %v253_v61 = vld [vmem:[%s883_s30] sm:$0x1] }
  0x28   : > { %v272_v4 = vld [vmem:[#allocation1] sm:$0xff]  ;;  %254 = vst [vmem:[#allocation2] sm:$0x1] %v253_v61 }
  0x29   : > { %284 = vst [vmem:[#allocation1 + $0x3] ss:$4 sm:$0xff] %v281_v3  ;;  %274 = vrot.lane.b32.xlu2 %v272_v4, %s789_s5  ;;  %v438_v1 = vld [vmem:[%s945_s2] sm:$0xff]  ;;  %s228_s5 = sand.u32 1, %s770_s13  }
  0x30   : > { %v285_v6 = vld [vmem:[#allocation1] sm:$0xff] }
  0x31   : > { %287 = vrot.lane.b32.xlu0 %v285_v6, %s790_s6  ;;  %296 = vst [vmem:[#allocation1] ss:$4 sm:$0xff] %v294_v5  ;;  %s619_s6 = sshll.u32 %s228_s5, 3 }
  0x38   : > { %v297_v8 = vld [vmem:[#allocation1] sm:$0xff] }
  0x39   : > { %299 = vrot.lane.b32.xlu1 %v297_v8, %s791_s7  ;;  %309 = vst [vmem:[#allocation1 + $0x1] ss:$4 sm:$0xff] %v306_v7  ;;  %s631_s7 = sshll.u32 %s778_s15, 3 }
  0x40   : > { %v310_v10 = vld [vmem:[#allocation1] sm:$0xff] }
  0x41   : > { %322 = vst [vmem:[#allocation1 + $0x2] ss:$4 sm:$0xff] %v319_v9 }
  0x48   : > { %v323_v12 = vld [vmem:[#allocation1] sm:$0xff] }
  0x49   : > { %335 = vst [vmem:[#allocation1 + $0x3] ss:$4 sm:$0xff] %v332_v11 }
  0x50   : > { %v336_v14 = vld [vmem:[#allocation1] sm:$0xff] }
  0x51   : > { %347 = vst [vmem:[#allocation1] ss:$4 sm:$0xff] %v345_v13 }
  0x58   : > { %v348_v16 = vld [vmem:[#allocation1] sm:$0xff] }
  0x59   : > { %350 = vrot.lane.b32.xlu0 %v348_v16, %s792_s8  ;;  %360 = vst [vmem:[#allocation1 + $0x1] ss:$4 sm:$0xff] %v357_v15 }
  0x60   : > { %v361_v18 = vld [vmem:[#allocation1] sm:$0xff] }
  0x61   : > { %373 = vst [vmem:[#allocation1 + $0x2] ss:$4 sm:$0xff] %v370_v17  ;;  %363 = vrot.lane.b32.xlu0 %v361_v18, %s793_s9 }
  0x68   : > { %v374_v20 = vld [vmem:[#allocation1] sm:$0xff] }
  0x69   : > { %376 = vrot.lane.b32.xlu1 %v374_v20, %s794_s10  ;;  %386 = vst [vmem:[#allocation1 + $0x3] ss:$4 sm:$0xff] %v383_v19  ;;  %s493_s10 = scalar_lea.hbm %s946_s3, %s631_s7 }
  0x70   : > { %v387_v22 = vld [vmem:[#allocation1] sm:$0xff] }
  0x71   : > { %389 = vrot.lane.b32.xlu1 %v387_v22, %s795_s11  ;;  %398 = vst [vmem:[#allocation1] ss:$4 sm:$0xff] %v396_v21  ;;  %s230_s11 = scalar_lea.vmem [#allocation3], %s619_s6 }
  0x78   : > { %v399_v24 = vld [vmem:[#allocation1] sm:$0xff] }
  0x79   : > { %411 = vst [vmem:[#allocation1 + $0x1] ss:$4 sm:$0xff] %v408_v23  ;;  %338 = vrot.lane.b32.xlu1 %v336_v14, %s796_s18  ;;  %401 = vrot.lane.b32.xlu2 %v399_v24, %s797_s19  ;;  %v252_v14 = vld [vmem:[%s944_s1] sm:$0xf]  ;;  %s495_s18 = sshll.u32 %s230_s11, 4  ;;  %s497_s19 = sshll.u32 %s493_s10, 4  ;;  %s496_s18 = int_to_ptr.vmem [resolvable:$true] %s495_s18  ;;  %s498_s19 = int_to_ptr.hbm [resolvable:$true] %s497_s19 }
  0x80   : > { %v412_v26 = vld [vmem:[#allocation1] sm:$0xff] }
  0x81   : > { %424 = vst [vmem:[#allocation1 + $0x2] ss:$4 sm:$0xff] %v421_v25  ;;  %414 = vrot.lane.b32.xlu2 %v412_v26, %s798_s21  ;;  %s481_s21 = scalar_lea.sflag [#allocation4], %s228_s5 }
  0x83   : > { %v275_v28 = vpop.permute.xlu2 %274 }
  0x84   : > { %v276_v29 = vrot.slane %v275_v28, 4 }
  0x86   : > { %v278_v30 = vsel %vm277_vm0, %v275_v28, %v276_v29 }
  0x87   : > { %280 = vst [vmem:[#allocation2] sm:$0x4] %v278_v30 }
  0x88   : > { %v425_v27 = vld [vmem:[#allocation1] sm:$0xff] }
  0x89   : > { %427 = vrot.lane.b32.xlu0 %v425_v27, %s799_s23  ;;  %312 = vrot.lane.b32.xlu2 %v310_v10, %s800_s26  ;;  %s722_s23 = sshra.s32 %s498_s19, 4  ;;  %s723_s23 = int_to_ptr.hbm [resolvable:$true] %s722_s23 }
  0x8a   : > { %s724_s15 = scalar_lea.hbm %s723_s23, 8  ;;  %p729_p1 = scmp.lt.s32.totalorder %s723_s23, %s946_s3 }
  0x8b   : > { %p725_p12 = scmp.ne.s32.totalorder %s723_s23, %s724_s15  ;;  %p730_p2 = scmp.lt.s32.totalorder %s728_s28, %s724_s15 }
  0x8d   : > { %p726_p13 = pnand %p725_p12, %p863_p4  ;;  %p731_p3 = por %p730_p2, %p729_p1 }
  0x8f   : > { %p727_p0 = pneg %p726_p13 }
  0x91   : > { %325 = vrot.lane.b32.xlu0 %v323_v12, %s801_s27  ;;  %441 = vperm.xlu2 %706, %v438_v1   ;;  %p732_p5 = pnand %p731_p3, %p727_p0 }
  0x93   : > { %v262_v31 = vpop.permute.xlu1 %261 }
  0x94   : > { %v263_v32 = vrot.slane %v262_v31, 4 }
  0x96   : > { %v265_v33 = vsel %vm264_vm1, %v262_v31, %v263_v32 }
  0x97   : > { %267 = vst [vmem:[#allocation2] sm:$0x2] %v265_v33 }
  0xa3   : > { %v288_v34 = vpop.permute.xlu0 %287 }
  0xa4   : > { %v289_v35 = vrot.slane %v288_v34, 4 }
  0xa6   : > { %v291_v36 = vsel %vm290_vm2, %v288_v34, %v289_v35 }
  0xa7   : > { %293 = vst [vmem:[#allocation2] sm:$0x8] %v291_v36 }
  0xab   : > { %v300_v37 = vpop.permute.xlu1 %299 }
  0xac   : > { %v301_v38 = vrot.slane %v300_v37, 4 }
  0xae   : > { %v303_v39 = vsel %vm302_vm3, %v300_v37, %v301_v38 }
  0xaf   : > { %305 = vst [vmem:[#allocation2 + $0x4] sm:$0x1] %v303_v39 }
  0xcb   : > { %v351_v40 = vpop.permute.xlu0 %350 }
  0xcc   : > { %v352_v41 = vrot.slane %v351_v40, 4 }
  0xce   : > { %v354_v42 = vsel %vm353_vm4, %v351_v40, %v352_v41 }
  0xcf   : > { %356 = vst [vmem:[#allocation2 + $0x8] sm:$0x1] %v354_v42 }
  0xd3   : > { %v364_v43 = vpop.permute.xlu0 %363  ;;  %v402_v44 = vpop.permute.xlu2 %401 }
  0xd4   : > { %v365_v45 = vrot.slane %v364_v43, 4  ;;  %v403_v46 = vrot.slane %v402_v44, 4 }
  0xd6   : > { %v367_v47 = vsel %vm366_vm5, %v364_v43, %v365_v45  ;;  %v405_v48 = vsel %vm404_vm6, %v402_v44, %v403_v46 }
  0xd7   : > { %369 = vst [vmem:[#allocation2 + $0x8] sm:$0x2] %v367_v47 }
  0xd8   : > { %407 = vst [vmem:[#allocation2 + $0xc] sm:$0x1] %v405_v48 }
  0xdb   : > { %v377_v49 = vpop.permute.xlu1 %376  ;;  %v415_v50 = vpop.permute.xlu2 %414 }
  0xdc   : > { %v378_v51 = vrot.slane %v377_v49, 4  ;;  %v416_v52 = vrot.slane %v415_v50, 4 }
  0xde   : > { %v380_v53 = vsel %vm379_vm7, %v377_v49, %v378_v51  ;;  %v418_v54 = vsel %vm417_vm8, %v415_v50, %v416_v52 }
  0xdf   : > { %382 = vst [vmem:[#allocation2 + $0x8] sm:$0x4] %v380_v53 }
  0xe0   : > { %420 = vst [vmem:[#allocation2 + $0xc] sm:$0x2] %v418_v54 }
  0xe3   : > { %v390_v55 = vpop.permute.xlu1 %389  ;;  %v313_v56 = vpop.permute.xlu2 %312 }
  0xe4   : > { %v391_v57 = vrot.slane %v390_v55, 4  ;;  %v314_v58 = vrot.slane %v313_v56, 4 }
  0xe6   : > { %v393_v59 = vsel %vm392_vm9, %v390_v55, %v391_v57  ;;  %v316_v60 = vsel %vm315_vm10, %v313_v56, %v314_v58 }
  0xe7   : > { %395 = vst [vmem:[#allocation2 + $0x8] sm:$0x8] %v393_v59 }
  0xe8   : > { %318 = vst [vmem:[#allocation2 + $0x4] sm:$0x2] %v316_v60 }
  0xeb   : > { %v339_v62 = vpop.permute.xlu1 %338  ;;  %v442_v15 = vpop.permute.xlu2 %441 }
  0xec   : > { %v340_v63 = vrot.slane %v339_v62, 4 }
  0xee   : > { %v342_v0 = vsel %vm341_vm11, %v339_v62, %v340_v63  ;;  %v627_v9 = vld [vmem:[#allocation2 + $0x8] sm:$0xf] }
  0xef   : > { %344 = vst [vmem:[#allocation2 + $0x4] sm:$0x8] %v342_v0 }
  0xfb   : > { %v428_v3 = vpop.permute.xlu0 %427 }
  0xfc   : > { %v429_v4 = vrot.slane %v428_v3, 4 }
  0xfe   : > { %v431_v5 = vsel %vm430_vm12, %v428_v3, %v429_v4 }
  0xff   : > { %433 = vst [vmem:[#allocation2 + $0xc] sm:$0x4] %v431_v5 }
 0x103   : > { %v326_v6 = vpop.permute.xlu0 %325 }
 0x104   : > { %v327_v7 = vrot.slane %v326_v6, 4 }
 0x106   : > { %v329_v8 = vsel %vm328_vm13, %v326_v6, %v327_v7  ;;  %v635_v10 = vld [vmem:[#allocation2 + $0x8] sm:$0x70] }
 0x107   : > { %331 = vst [vmem:[#allocation2 + $0x4] sm:$0x4] %v329_v8  ;;  %v628_v11 = vor.u32 %v635_v10, %v627_v9 }
 0x109   : > { %v461_v12 = vsel %vm459_vm14, %v628_v11, 0 }
 0x10a   : > { %469 = vmatpush.bf16.msra.mxu0 %v461_v12 }
 0x10e   : > { %v634_v13 = vld [vmem:[#allocation2] sm:$0xff] }
 0x10f   : > { %470 = vmatpush.bf16.msra.mxu0 %v634_v13 }
 0x112   : > { %629 = vmatmul.msk.bf16.vlgmr.msra.gmra.mxu0 %vm455_vm15, %v252_v14 }
 0x18f   : > { %v472_v16 = vpop.f32.mrf.mxu0 }
 0x190   : > { %v473_v17 = vadd.f32 %v472_v16, %v442_v15 }
 0x192   : > { %vm476_vm0 = vcmp.gt.f32.partialorder %v473_v17, 0.0  ;;  %v477_v18 = vmul.f32 0.2, %v473_v17 }
 0x194   : > { %v478_v19 = vsel %vm476_vm0, %v473_v17, %v477_v18 }
 0x195   : > { %479 = vst [vmem:[%s230_s11] sm:$0xff] %v478_v19 }
 0x196   : > { %735 = shalt.err (!%p732_p5)
}
 0x197   : > { %636 = dma.vmem_to_hbm [thread:$0]  (%p863_p4), %s496_s18, 128, %s498_s19, %s481_s21   ;;  %v474_v20 = vpop.f32.mrf.mxu0 }
 0x198 PF: > { %p642_p6 = scmp.ge.s32.totalorder %s786_s17, 2  ;;  %s509_s4 = sand.u32 1, %s766_s12  }
 0x199   : > { %s510_s5 = scalar_lea.sflag [#allocation4], %s509_s4 }
 0x19a   : > { %p639_p7 = pnand %p642_p6, %p870_p8 }
 0x19c   : > { %p640_p9 = pneg %p639_p7 }
 0x19e   : > { %761 = dma.done.wait (%p640_p9), %s510_s5, 128  }
 0x19f   : > { %763 = vsyncadd (%p640_p9), %s510_s5, 4294967168  ;;  %s16_s17 = sadd.s32 1, %s786_s17   ;;  %s949_s12 = smov %s770_s13 }
 0x1a0   : > { %p13_p10 = scmp.ge.s32.totalorder %s16_s17, 4   ;;  %s950_s13 = smov %s774_s14 }
 0x1a1   : > { %s951_s14 = smov %s876_s25  ;;  %s952_s15 = smov %s782_s16 }
 0x1a2   : > { %s953_s16 = smov %s955_s20  ;;  %15 = sbr.rel (!%p13_p10) target bundleno = 4 (0x4), region = 84 }
 0x1a7   :  { %516 = vsyncpa [#allocation4], 1 }
 0x1a8   :  { %518 = vsyncpa [#allocation4 + $0x1], 1 }

</bundles_post_ra>
